<compile_context>
chip_gen: v7x
topology: tpu7x:2x2x1
jax: 0.10.0
libtpu: 0.0.40
codegen_flags: <defaults>
</compile_context>

<pallas_src>
import jax
import jax.numpy as jnp
from jax import lax
from jax.experimental import pallas as pl
from jax.experimental.pallas import tpu as pltpu


def _linear_kernel_kernel(x1_ref, x2t_ref, inv_ref, c_row_ref, c_col_ref,
                          o_ref, a_scratch):
    # x1_ref: (TN, D), x2t_ref: (D, TM), inv_ref/c_row_ref: (1, D),
    # c_col_ref: (D, 1), o_ref: (TN, TM), a_scratch: (TN, D) f32.

    # The x1 tile is resident for the whole inner M sweep: compute the scaled,
    # centered LHS once per i (j == 0) and reuse it for every j.
    @pl.when(pl.program_id(1) == 0)
    def _():
        a_scratch[...] = (x1_ref[...] - c_row_ref[...]) * inv_ref[...]

    b = x2t_ref[...] - c_col_ref[...]                      # (D, TM)
    # NN-shaped contraction on the feature axis (no in-kernel transpose).
    o_ref[...] = lax.dot_general(
        a_scratch[...], b, (((1,), (0,)), ((), ())),
        preferred_element_type=jnp.float32)


def _round_up(x, m):
    return ((x + m - 1) // m) * m


def linear_kernel(x1, x2, length_scales, center, signal_variance,
                  tile_n=512, tile_m=1024):
    """|sv| * ((x1-c)/ls) @ ((x2-c)/ls).T with a tiled Pallas TPU kernel."""
    N, D = x1.shape
    M, D2 = x2.shape
    assert D == D2, "feature dims must match"

    x1 = x1.astype(jnp.float32)
    # Pre-transpose x2 in the wrapper (tiny O(M*D) op) so the kernel's RHS is
    # (D, TM): lane-dense and consumed by the MXU without an XLU transpose.
    x2t = x2.astype(jnp.float32).T                         # (D, M)
    ls = length_scales.astype(jnp.float32)
    c = center.astype(jnp.float32)
    sv = jnp.abs(signal_variance.astype(jnp.float32)).reshape(())

    # Fold |sv| / ls^2 onto the x1 side (mathematically identical to
    # (x1-c) diag(1/ls^2) (x2-c)^T * |sv|).
    inv2 = (sv / (ls * ls)).reshape(1, D)
    c_row = c.reshape(1, D)
    c_col = c.reshape(D, 1)

    # Tile sizes: TN multiple of 8 (sublane), TM multiple of 128 (lane-dense
    # output stores). No input padding / output slicing: Pallas masks the
    # partial edge tiles.
    TN = min(tile_n, _round_up(N, 8))
    TM = min(tile_m, _round_up(M, 128))
    grid = (pl.cdiv(N, TN), pl.cdiv(M, TM))   # M (j) inner -> x1 tile stays hot

    cost = pl.CostEstimate(
        flops=2 * N * M * D,
        transcendentals=0,
        bytes_accessed=4 * (N * D + M * D + N * M))

    out = pl.pallas_call(
        _linear_kernel_kernel,
        out_shape=jax.ShapeDtypeStruct((N, M), jnp.float32),
        grid_spec=pltpu.PrefetchScalarGridSpec(
            num_scalar_prefetch=0,
            grid=grid,
            in_specs=[
                pl.BlockSpec((TN, D), lambda i, j: (i, 0)),   # x1 tile
                pl.BlockSpec((D, TM), lambda i, j: (0, j)),   # x2^T tile
                pl.BlockSpec((1, D), lambda i, j: (0, 0)),    # |sv|/ls^2
                pl.BlockSpec((1, D), lambda i, j: (0, 0)),    # center (row)
                pl.BlockSpec((D, 1), lambda i, j: (0, 0)),    # center (col)
            ],
            out_specs=pl.BlockSpec((TN, TM), lambda i, j: (i, j)),
            scratch_shapes=[pltpu.VMEM((TN, D), jnp.float32)],
        ),
        compiler_params=pltpu.CompilerParams(
            # j carries state through the scratch -> "arbitrary"; i stays
            # "parallel" for megacore splitting on v7x.
            dimension_semantics=("parallel", "arbitrary")),
        cost_estimate=cost,
    )(x1, x2t, inv2, c_row, c_col)

    return out
    # TODO(synk): add a K-tiled (feature-axis) accumulator path + bf16 operands
    # for very large D; unnecessary for the small-D GP regime exercised here.


def _reference(x1, x2, length_scales, center, signal_variance):
    a = (x1 - center) / length_scales
    b = (x2 - center) / length_scales
    return a @ b.T * jnp.abs(signal_variance)


if __name__ == "__main__":
    key = jax.random.PRNGKey(0)

    # Deterministic parameter init mirroring LinearKernel.__init__:
    #   length_scales = ones(D) * initial_length_scale
    #   signal_variance = [initial_signal_variance]
    #   center = zeros(D)
    initial_length_scale = 0.5
    initial_signal_variance = 2.0

    ok = True
    for (N, M, D) in [(8, 8, 32), (200, 136, 32)]:
        k1, k2, key = jax.random.split(key, 3)
        x1 = jax.random.normal(k1, (N, D), dtype=jnp.float32)
        x2 = jax.random.normal(k2, (M, D), dtype=jnp.float32)

        length_scales = jnp.ones((D,), jnp.float32) * initial_length_scale
        signal_variance = jnp.array([initial_signal_variance], jnp.float32)
        center = jnp.zeros((D,), jnp.float32)

        out = linear_kernel(x1, x2, length_scales, center, signal_variance)
        out = jax.block_until_ready(out)

        ref = _reference(x1, x2, length_scales, center, signal_variance)
        ok = ok and (out.shape == (N, M)) and bool(
            jnp.allclose(out, ref, atol=1e-4, rtol=1e-4))

    assert ok
    print("KERNEL_OK")
</pallas_src>

<mosaic_0001>
module attributes {stable_mosaic.version = 11 : i64} {
  func.func @_linear_kernel_kernel(%arg0: i32, %arg1: i32, %arg2: memref<8x32xf32, #tpu.memory_space<vmem>>, %arg3: memref<32x128xf32, #tpu.memory_space<vmem>>, %arg4: memref<1x32xf32, #tpu.memory_space<vmem>>, %arg5: memref<1x32xf32, #tpu.memory_space<vmem>>, %arg6: memref<32x1xf32, #tpu.memory_space<vmem>>, %arg7: memref<8x128xf32, #tpu.memory_space<vmem>>, %arg8: memref<8x32xf32, #tpu.memory_space<vmem>>) attributes {dimension_semantics = [#tpu.dimension_semantics<parallel>, #tpu.dimension_semantics<arbitrary>], iteration_bounds = array<i64: 1, 1>, scalar_prefetch = 0 : i64, scratch_operands = 1 : i64, tpu.core_type = #tpu.core_type<tc>, window_params = [{transform_indices = @transform_0, window_bounds = array<i64: 8, 32>}, {transform_indices = @transform_1, window_bounds = array<i64: 32, 128>}, {pipeline_mode = #tpu.pipeline_mode<synchronous>, transform_indices = @transform_2, window_bounds = array<i64: 1, 32>}, {pipeline_mode = #tpu.pipeline_mode<synchronous>, transform_indices = @transform_3, window_bounds = array<i64: 1, 32>}, {pipeline_mode = #tpu.pipeline_mode<synchronous>, transform_indices = @transform_4, window_bounds = array<i64: 32, 1>}, {transform_indices = @transform_5, window_bounds = array<i64: 8, 128>}]} {
    %c0_i32 = arith.constant 0 : i32
    %0 = arith.cmpi eq, %arg1, %c0_i32 : i32
    %1 = arith.extui %0 : i1 to i32
    %c0_i32_0 = arith.constant 0 : i32
    %2 = arith.cmpi ne, %1, %c0_i32_0 : i32
    scf.if %2 {
      %c0_8 = arith.constant 0 : index
      %c0_9 = arith.constant 0 : index
      %10 = vector.load %arg2[%c0_8, %c0_9] : memref<8x32xf32, #tpu.memory_space<vmem>>, vector<8x32xf32>
      %c0_10 = arith.constant 0 : index
      %c0_11 = arith.constant 0 : index
      %11 = vector.load %arg5[%c0_10, %c0_11] : memref<1x32xf32, #tpu.memory_space<vmem>>, vector<1x32xf32>
      %12 = vector.broadcast %11 : vector<1x32xf32> to vector<8x32xf32>
      %13 = arith.subf %10, %12 : vector<8x32xf32>
      %c0_12 = arith.constant 0 : index
      %c0_13 = arith.constant 0 : index
      %14 = vector.load %arg4[%c0_12, %c0_13] : memref<1x32xf32, #tpu.memory_space<vmem>>, vector<1x32xf32>
      %15 = vector.broadcast %14 : vector<1x32xf32> to vector<8x32xf32>
      %16 = arith.mulf %13, %15 : vector<8x32xf32>
      %c0_14 = arith.constant 0 : index
      %c0_15 = arith.constant 0 : index
      %17 = vector.load %arg8[%c0_14, %c0_15] : memref<8x32xf32, #tpu.memory_space<vmem>>, vector<8x32xf32>
      tpu.vector_store %arg8[%c0_14, %c0_15], %16 {strides = array<i32>} : memref<8x32xf32, #tpu.memory_space<vmem>>, vector<8x32xf32>,
    } else {
    }
    %c0 = arith.constant 0 : index
    %c0_1 = arith.constant 0 : index
    %3 = vector.load %arg3[%c0, %c0_1] : memref<32x128xf32, #tpu.memory_space<vmem>>, vector<32x128xf32>
    %c0_2 = arith.constant 0 : index
    %c0_3 = arith.constant 0 : index
    %4 = vector.load %arg6[%c0_2, %c0_3] : memref<32x1xf32, #tpu.memory_space<vmem>>, vector<32x1xf32>
    %5 = vector.broadcast %4 : vector<32x1xf32> to vector<32x128xf32>
    %6 = arith.subf %3, %5 : vector<32x128xf32>
    %c0_4 = arith.constant 0 : index
    %c0_5 = arith.constant 0 : index
    %7 = vector.load %arg8[%c0_4, %c0_5] : memref<8x32xf32, #tpu.memory_space<vmem>>, vector<8x32xf32>
    %cst = arith.constant dense<0.000000e+00> : vector<8x128xf32>
    %8 = tpu.matmul %7, %6, %cst {dimension_numbers = #tpu.dot_dimension_numbers<[1], [0], [0], [1], [0, 0, 1, 1], [], []>} : vector<8x32xf32>, vector<32x128xf32>, vector<8x128xf32> -> vector<8x128xf32>
    %c0_6 = arith.constant 0 : index
    %c0_7 = arith.constant 0 : index
    %9 = vector.load %arg7[%c0_6, %c0_7] : memref<8x128xf32, #tpu.memory_space<vmem>>, vector<8x128xf32>
    tpu.vector_store %arg7[%c0_6, %c0_7], %8 {strides = array<i32>} : memref<8x128xf32, #tpu.memory_space<vmem>>, vector<8x128xf32>,
    return
  }
  func.func @transform_0(%arg0: i32, %arg1: i32) -> (i32, i32) {
    %c0_i32 = arith.constant 0 : i32
    %c0_i32_0 = arith.constant 0 : i32
    return %arg0, %c0_i32 : i32, i32
  }
  func.func @transform_1(%arg0: i32, %arg1: i32) -> (i32, i32) {
    %c0_i32 = arith.constant 0 : i32
    %c0_i32_0 = arith.constant 0 : i32
    return %c0_i32, %arg1 : i32, i32
  }
  func.func @transform_2(%arg0: i32, %arg1: i32) -> (i32, i32) {
    %c0_i32 = arith.constant 0 : i32
    %c0_i32_0 = arith.constant 0 : i32
    %c0_i32_1 = arith.constant 0 : i32
    return %c0_i32, %c0_i32_0 : i32, i32
  }
  func.func @transform_3(%arg0: i32, %arg1: i32) -> (i32, i32) {
    %c0_i32 = arith.constant 0 : i32
    %c0_i32_0 = arith.constant 0 : i32
    %c0_i32_1 = arith.constant 0 : i32
    return %c0_i32, %c0_i32_0 : i32, i32
  }
  func.func @transform_4(%arg0: i32, %arg1: i32) -> (i32, i32) {
    %c0_i32 = arith.constant 0 : i32
    %c0_i32_0 = arith.constant 0 : i32
    %c0_i32_1 = arith.constant 0 : i32
    return %c0_i32, %c0_i32_0 : i32, i32
  }
  func.func @transform_5(%arg0: i32, %arg1: i32) -> (i32, i32) {
    %c0_i32 = arith.constant 0 : i32
    return %arg0, %arg1 : i32, i32
  }
}

</mosaic_0001>

<bundles_post_ra>
// kernel: tpu_custom_call.1
= control target key start
LH: loop header
LB: loop body
LE: loop exit
PB: predicated region body
PF: predicated region fallthrough
CT: control target
= control target key end

     0   :  { %v222_v2 = vmov 0   ;;  %s304_s0 = inlined_call_operand.vmem [shape: f32[8,32], index: 0, kind: input, shape index: {}]   ;;  %s305_s1 = inlined_call_operand.vmem [shape: f32[32,8], index: 1, kind: input, shape index: {}]   ;;  %s306_s2 = inlined_call_operand.vmem [shape: f32[1,32], index: 2, kind: input, shape index: {}]   ;;  %s307_s3 = inlined_call_operand.vmem [shape: f32[1,32], index: 3, kind: input, shape index: {}]   ;;  %s308_s4 = inlined_call_operand.vmem [shape: f32[32,1], index: 4, kind: input, shape index: {}]   ;;  %s309_s5 = inlined_call_operand.hbm [shape: f32[8,8], index: 5, kind: output, shape index: {}]  }
   0x1   :  { %v50_v0 = vld [vmem:[%s308_s4 + $0x10] sm:$0xff]  ;;  %v48_v1 = vld [vmem:[%s308_s4] sm:$0xff]  ;;  %197 = vset.pattern.permute.xlu1 %v222_v2  ;;  %196 = vset.pattern.permute.xlu0 %v222_v2 }
   0x2   :  { %64 = vperm.xlu1 %197, %v50_v0   ;;  %54 = vperm.xlu0 %196, %v48_v1  }
   0x3   :  { %10 = vsyncpa [#allocation4], 0  ;;  %v51_v3 = vld [vmem:[%s308_s4 + $0x18] sm:$0xff]  ;;  %v49_v4 = vld [vmem:[%s308_s4 + $0x8] sm:$0xff]  ;;  %vm42_vm0 = vcmask 261120   ;;  %v223_v10 = vmov 0.0|0.0  }
   0x4   :  { %v25_v5 = vld [vmem:[%s304_s0] sm:$0xff]  ;;  %185 = vmatprep.subr.bf16.mxu0 %v223_v10  ;;  %vm224_vm1 = vmmov 0   ;;  %v225_v11 = vmov 0.0   ;;  %v45_v15 = vld [vmem:[%s305_s1 + $0x8] sm:$0xff]  ;;  %v46_v16 = vld [vmem:[%s305_s1 + $0x10] sm:$0xff]  ;;  %s226_s11 = smov [#allocation3]  }
   0x5   :  { %v166_v6 = vld [vmem:[%s307_s3] ss:$0 sm:$0xff]  ;;  %182 = vmatprep.mubr.msk.f32.mxu0 %vm224_vm1, %v225_v11  ;;  %v47_v18 = vld [vmem:[%s305_s1 + $0x18] sm:$0xff]  ;;  %s158_s12 = sshll.u32 %s226_s11, 4  ;;  %s159_s12 = int_to_ptr.vmem [resolvable:$true] %s158_s12 }
   0x6   :  { %v33_v7 = vsub.f32 %v25_v5, %v166_v6  ;;  %69 = vperm.xlu1 %197, %v51_v3   ;;  %59 = vperm.xlu0 %196, %v49_v4   ;;  %v167_v8 = vld [vmem:[%s306_s2] ss:$0 sm:$0xff]  ;;  %p203_p1 = scmp.lt.s32.totalorder %s159_s12, %s159_s12 }
   0x7   :  { %v44_v14 = vld [vmem:[%s305_s1] sm:$0xff]  ;;  %s198_s1 = scalar_lea.vmem %s159_s12, 128 }
   0x8   :  { %v41_v9 = vmul.f32 %v167_v8, %v33_v7  ;;  %p199_p0 = scmp.ne.s32.totalorder %s159_s12, %s198_s1  ;;  %p204_p2 = scmp.lt.s32.totalorder %s198_s1, %s198_s1 }
   0xa   :  { %43 = vst.msk [vmem:[#allocation2] sm:$0xff] %vm42_vm0, %v41_v9  ;;  %p205_p3 = por %p204_p2, %p203_p1 }
   0xc   :  { %p206_p4 = pnand %p205_p3, %p199_p0 }
  0x11   :  { %v76_v26 = vld [vmem:[#allocation2] sm:$0xff] }
  0x81   :  { %v65_v12 = vpop.permute.xlu1 %64  ;;  %v55_v13 = vpop.permute.xlu0 %54 }
  0x82   :  { %v72_v20 = vsub.f32 %v44_v14, %v55_v13  ;;  %v74_v22 = vsub.f32 %v46_v16, %v65_v12 }
  0x85   :  { %v70_v17 = vpop.permute.xlu1 %69  ;;  %v60_v19 = vpop.permute.xlu0 %59 }
  0x86   :  { %v73_v21 = vsub.f32 %v45_v15, %v60_v19  ;;  %v75_v23 = vsub.f32 %v47_v18, %v70_v17 }
  0x88   :  { %v186_v24 = vpack.c.bf16 %v73_v21, %v72_v20  ;;  %v189_v25 = vpack.c.bf16 %v75_v23, %v74_v22 }
  0x8a   :  { %187 = vmatpush3.bf16.msra.mxu0 %v186_v24 }
  0x8b   :  { %188 = vmatprep.subr.bf16.mxu0 %v223_v10 }
  0x8e   :  { %190 = vmatpush3.bf16.msra.mxu0 %v189_v25 }
  0x91   :  { %183 = vmatmul.mubr.msk.f32.vlgmr.msra.gmra.mrb[0].mxu0 %vm42_vm0, %v76_v26 }
 0x164   :  { %v147_v27 = vpop.f32.mrb[0].mxu0 }
 0x165   :  { %151 = vst [vmem:[#allocation3] sm:$0xff] %v147_v27  ;;  %v184_v28 = vpop.f32.mrb[1].mxu0 }
 0x166   :  { %209 = shalt.err (!%p206_p4)
}
 0x167   :  { %s210_s15 = scalar_lea.hbm %s309_s5, 128 }
 0x168   :  { %p211_p5 = scmp.ne.s32.totalorder %s309_s5, %s210_s15  ;;  %p214_p6 = scmp.lt.u32.totalorder %s210_s15, %s309_s5 }
 0x16a   :  { %p216_p7 = pnand %p214_p6, %p211_p5 }
 0x16c   :  { %219 = shalt.err (!%p216_p7)
}
 0x16d   :  { %161 = dma.vmem_to_hbm [thread:$0]  %s159_s12, 128, %s309_s5, [#allocation4]  }
 0x16e   :  { %220 = dma.done.wait [#allocation4], 128  }
 0x16f   :  { %221 = vsyncadd [#allocation4], 4294967168 }
 0x170   :  { %165 = vsyncpa [#allocation4], 1 }

</bundles_post_ra>
